<compile_context>
chip_gen: v6e
topology: v6e:2x2x1
jax: 0.10.0
libtpu: 0.0.40
codegen_flags: <defaults>
</compile_context>

<pallas_src>
import functools
import math

import jax
import jax.numpy as jnp
from jax import lax
from jax.experimental import pallas as pl
from jax.experimental.pallas import tpu as pltpu

_MASK_VALUE = -1.0e6   # same constant as the PyTorch sequence_mask()
_PAD_NEG = -1.0e30     # padded Tk columns + running-max init (finite, exp->0)


def _round_up(x, m):
    return ((x + m - 1) // m) * m


def _pad_to(x, shape):
    pads = [(0, t - s) for s, t in zip(x.shape, shape)]
    if all(p == (0, 0) for p in pads):
        return x
    return jnp.pad(x, pads)


def _default_blocks():
    """Generation-aware default tile sizes (best effort, safe fallback)."""
    try:
        kind = jax.devices()[0].device_kind.lower()
    except Exception:
        kind = ""
    if "v5" in kind:
        # v5e: 4x128x128 MXU -> keep tk=128; big tq cuts K/V re-streaming.
        return 256, 128
    # v6e / v7x: 256x256 MXU.
    return 256, 256


def _flash_attn_kernel(nblk_ref, q_ref, k_ref, v_ref, *rest,
                       scale, tk, seq_k, nqb, has_vl, has_kpad):
    """One (batch, q-tile, k-tile) step of online-softmax attention.

    nblk_ref: SMEM (B*nqb,) int32 — number of K blocks needed per (b, q-tile)
    q_ref: (tq, D)   k_ref: (tk, D)   v_ref: (tk, Dv)
    vl_ref (optional): (tq, 1) int32   o_ref: (tq, Dv)
    scratch: m_ref/l_ref (tq, 1) f32, acc_ref (tq, Dv) f32, qs_ref (tq, D)
    """
    if has_vl:
        vl_ref, o_ref, m_ref, l_ref, acc_ref, qs_ref = rest
    else:
        vl_ref = None
        o_ref, m_ref, l_ref, acc_ref, qs_ref = rest

    b, qi, ki = pl.program_id(0), pl.program_id(1), pl.program_id(2)
    nb = nblk_ref[b * nqb + qi]            # K blocks actually needed

    @pl.when(ki == 0)
    def _init():
        # Hoisted: fold 1/sqrt(d) into Q once per (b, q-tile), not per K-step.
        qs_ref[...] = q_ref[...] * scale
        m_ref[...] = jnp.full_like(m_ref, _PAD_NEG)
        l_ref[...] = jnp.zeros_like(l_ref)
        acc_ref[...] = jnp.zeros_like(acc_ref)

    @pl.when(ki < nb)                       # skip fully-masked K tiles
    def _body():
        # Q.K^T without materializing a transpose of K: contract last dims.
        s = lax.dot_general(qs_ref[...], k_ref[...], (((1,), (1,)), ((), ())),
                            preferred_element_type=jnp.float32)   # (tq, tk)

        # Mask, specialized at trace time. col/penalty are (1, tk) rows;
        # broadcasting against vl (tq, 1) produces the (tq, tk) select.
        if has_vl or has_kpad:
            col = ki * tk + lax.broadcasted_iota(jnp.int32, (1, tk), 1)
        if has_vl:
            if has_kpad:
                # padded Tk columns get a harder penalty so they never
                # contribute weight, matching the unpadded reference exactly.
                penalty = jnp.where(col < seq_k, jnp.float32(_MASK_VALUE),
                                    jnp.float32(_PAD_NEG))
            else:
                penalty = jnp.float32(_MASK_VALUE)
            s = jnp.where(col < vl_ref[...], s, penalty)
        elif has_kpad:
            s = jnp.where(col < seq_k, s, jnp.float32(_PAD_NEG))

        # online softmax update (statistics always in f32)
        m_prev = m_ref[...]
        m_new = jnp.maximum(m_prev, jnp.max(s, axis=-1, keepdims=True))
        alpha = jnp.exp(m_prev - m_new)
        p = jnp.exp(s - m_new)
        l_ref[...] = alpha * l_ref[...] + jnp.sum(p, axis=-1, keepdims=True)
        acc_ref[...] = alpha * acc_ref[...] + jnp.dot(
            p.astype(v_ref.dtype), v_ref[...],
            preferred_element_type=jnp.float32)
        m_ref[...] = m_new

        @pl.when(ki == nb - 1)
        def _finalize():
            # Normalization deferred to one pass over (tq, Dv).
            # Dropout == identity (eval mode / p = 0).
            # approx=True would push this onto the EUP; kept exact here.
            o_ref[...] = (acc_ref[...] *
                          pl.reciprocal(l_ref[...], approx=False)
                          ).astype(o_ref.dtype)


def dot_product_attention(queries, keys, values, valid_lens=None, *,
                          block_q=None, block_k=None, mxu_dtype=None):
    """Pallas equivalent of DotProductAttention.forward (eval mode).

    mxu_dtype: optional dtype (e.g. jnp.bfloat16) for the two MXU matmuls /
    streamed operands; softmax statistics and the output dtype stay as-is.
    """
    B, Tq, D = queries.shape
    _, Tk, Dv = values.shape
    out_dtype = queries.dtype
    scale = 1.0 / math.sqrt(D)          # scale uses the ORIGINAL feature dim

    if block_q is None or block_k is None:
        dq, dk = _default_blocks()
        block_q = block_q or dq
        block_k = block_k or dk

    q, k, v = queries, keys, values
    if mxu_dtype is not None and q.dtype != mxu_dtype:
        q, k, v = q.astype(mxu_dtype), k.astype(mxu_dtype), v.astype(mxu_dtype)

    # Tile sizes: sublane-multiple of 8, capped by (rounded) sequence extents.
    tq = min(block_q, _round_up(Tq, 8))
    tk = min(block_k, _round_up(Tk, 8))
    tq_pad, tk_pad = _round_up(Tq, tq), _round_up(Tk, tk)
    nqb, nkb = tq_pad // tq, tk_pad // tk

    # Feature dims stay at NATIVE width (full-extent last block dim is legal):
    # no D/Dv padding, no wasted HBM bytes on small head dims.
    q = _pad_to(q, (B, tq_pad, D))
    k = _pad_to(k, (B, tk_pad, D))
    v = _pad_to(v, (B, tk_pad, Dv))

    has_kpad = tk_pad > Tk
    has_vl = valid_lens is not None

    if has_vl:
        if valid_lens.ndim == 1:
            vl2d = jnp.broadcast_to(valid_lens.astype(jnp.int32)[:, None],
                                    (B, Tq))
        else:
            vl2d = valid_lens.astype(jnp.int32).reshape(B, Tq)
        vl2d = jnp.minimum(vl2d, Tk)
        # Per-(b, q-tile) number of K blocks actually needed.  Rows with
        # valid_len == 0 degenerate to uniform attention over ALL real keys
        # in the reference, so they require every block.
        eff = jnp.where(vl2d > 0, vl2d, jnp.int32(Tk))
        eff = jnp.pad(eff, ((0, 0), (0, tq_pad - Tq)), constant_values=1)
        nblk = eff.reshape(B, nqb, tq).max(axis=-1)
        nblk = jnp.clip((nblk + tk - 1) // tk, 1, nkb).astype(jnp.int32)
        vl = _pad_to(vl2d, (B, tq_pad)).reshape(B, tq_pad, 1)
    else:
        nblk = jnp.full((B, nqb), nkb, dtype=jnp.int32)
        vl = None
    nblk = nblk.reshape(-1)   # 1-D -> cheap SMEM layout, simple indexing

    kernel = functools.partial(
        _flash_attn_kernel, scale=scale, tk=tk, seq_k=Tk, nqb=nqb,
        has_vl=has_vl, has_kpad=has_kpad)

    # Q / vl / output resident across the Tk loop (index_map ignores ki).
    def q_map(b, qi, ki, nblk_ref):
        return (b, qi, 0)

    # Clamp the K/V block index for skipped steps: unchanged index => the
    # pipeline suppresses the re-DMA, so skipped tiles cost no HBM traffic.
    def kv_map(b, qi, ki, nblk_ref):
        return (b, jnp.minimum(ki, nblk_ref[b * nqb + qi] - 1), 0)

    in_specs = [
        pl.BlockSpec((pl.Squeezed(), tq, D), q_map),
        pl.BlockSpec((pl.Squeezed(), tk, D), kv_map),
        pl.BlockSpec((pl.Squeezed(), tk, Dv), kv_map),
    ]
    inputs = [q, k, v]
    if has_vl:
        in_specs.append(pl.BlockSpec((pl.Squeezed(), tq, 1), q_map))
        inputs.append(vl)

    itemsize = jnp.dtype(q.dtype).itemsize
    cost = pl.CostEstimate(
        flops=2 * B * Tq * Tk * (D + Dv),
        transcendentals=B * Tq * Tk,
        # K/V are re-streamed once per Q tile; unpadded dims.
        bytes_accessed=(B * Tq * D + nqb * B * Tk * (D + Dv)
                        + B * Tq * Dv) * itemsize
        + (int(vl.size) * 4 if has_vl else 0) + int(nblk.size) * 4,
    )

    # Explicit VMEM budget: double-buffered streamed blocks + resident
    # blocks/scratch, generous headroom, hard cap well under v7x's 64 MiB.
    per_step = 2 * ((tq * D + tk * (D + Dv)) * itemsize + tq * 4)
    resident = (tq * Dv + tq * D) * itemsize + (tq * Dv + 2 * tq) * 4
    vmem_limit = int(min(48 * 1024 * 1024,
                         max(32 * 1024 * 1024, 4 * (per_step + resident))))

    out = pl.pallas_call(
        kernel,
        out_shape=jax.ShapeDtypeStruct((B, tq_pad, Dv), out_dtype),
        grid_spec=pltpu.PrefetchScalarGridSpec(
            num_scalar_prefetch=1,
            grid=(B, nqb, nkb),
            in_specs=in_specs,
            out_specs=pl.BlockSpec((pl.Squeezed(), tq, Dv), q_map),
            scratch_shapes=[
                pltpu.VMEM((tq, 1), jnp.float32),     # running max m
                pltpu.VMEM((tq, 1), jnp.float32),     # running sum l
                pltpu.VMEM((tq, Dv), jnp.float32),    # unnormalized acc
                pltpu.VMEM((tq, D), q.dtype),         # pre-scaled Q
            ],
        ),
        compiler_params=pltpu.CompilerParams(
            dimension_semantics=("parallel", "parallel", "arbitrary"),
            vmem_limit_bytes=vmem_limit,
        ),
        cost_estimate=cost,
    )(nblk, *inputs)

    return out[:, :Tq, :]


def _reference(queries, keys, values, valid_lens):
    """Pure-JAX reference mirroring the PyTorch module semantics."""
    d = queries.shape[-1]
    scores = jnp.einsum("bqd,bkd->bqk", queries, keys) / math.sqrt(d)
    B, Tq, Tk = scores.shape
    if valid_lens is None:
        vl = jnp.full((B, Tq), Tk, dtype=jnp.int32)
    elif valid_lens.ndim == 1:
        vl = jnp.broadcast_to(valid_lens.astype(jnp.int32)[:, None], (B, Tq))
    else:
        vl = valid_lens.astype(jnp.int32).reshape(B, Tq)
    col = jnp.arange(Tk, dtype=jnp.int32)[None, None, :]
    scores = jnp.where(col < vl[:, :, None], scores, _MASK_VALUE)
    w = jax.nn.softmax(scores, axis=-1)
    return jnp.einsum("bqk,bkv->bqv", w, values)


if __name__ == "__main__":
    key = jax.random.PRNGKey(0)
    k_q, k_k, k_v, k_l = jax.random.split(key, 4)

    # Small shapes consistent with the module.
    B, Tq, Tk, D, Dv = 2, 8, 8, 32, 32
    queries = jax.random.normal(k_q, (B, Tq, D), dtype=jnp.float32)
    keys = jax.random.normal(k_k, (B, Tk, D), dtype=jnp.float32)
    values = jax.random.normal(k_v, (B, Tk, Dv), dtype=jnp.float32)
    valid_lens = jnp.array([3, 6], dtype=jnp.int32)

    out = jax.block_until_ready(
        dot_product_attention(queries, keys, values, valid_lens))
    ref = _reference(queries, keys, values, valid_lens)
    assert out.shape == (B, Tq, Dv)
    assert jnp.allclose(out, ref, atol=1e-4, rtol=1e-4), "mismatch vs reference"

    # valid_lens=None path (no mask ops emitted at all).
    out2 = jax.block_until_ready(
        dot_product_attention(queries, keys, values, None))
    ref2 = _reference(queries, keys, values, None)
    assert jnp.allclose(out2, ref2, atol=1e-4, rtol=1e-4), "mismatch (no mask)"

    # Exercise the tiled flash path: multiple Tk blocks, Tq/Tk padding,
    # ragged 2-D valid_lens (per batch, per query row) with K-block skipping.
    B2, Tq2, Tk2, D2, Dv2 = 2, 40, 72, 32, 48
    q2 = jax.random.normal(k_q, (B2, Tq2, D2), dtype=jnp.float32)
    k2 = jax.random.normal(k_k, (B2, Tk2, D2), dtype=jnp.float32)
    v2 = jax.random.normal(k_v, (B2, Tk2, Dv2), dtype=jnp.float32)
    vl2 = jax.random.randint(k_l, (B2, Tq2), 1, Tk2 + 1).astype(jnp.int32)
    out3 = jax.block_until_ready(
        dot_product_attention(q2, k2, v2, vl2, block_q=16, block_k=32))
    ref3 = _reference(q2, k2, v2, vl2)
    assert jnp.allclose(out3, ref3, atol=1e-4, rtol=1e-4), "mismatch (tiled)"

    print("KERNEL_OK")
</pallas_src>

<mosaic_0001>
module attributes {stable_mosaic.version = 11 : i64} {
  func.func @_flash_attn_kernel(%arg0: i32, %arg1: i32, %arg2: i32, %arg3: memref<2xi32, #tpu.memory_space<smem>>, %arg4: memref<1x8x32xf32, #tpu.memory_space<vmem>>, %arg5: memref<1x8x32xf32, #tpu.memory_space<vmem>>, %arg6: memref<1x8x32xf32, #tpu.memory_space<vmem>>, %arg7: memref<1x8x1xi32, #tpu.memory_space<vmem>>, %arg8: memref<1x8x32xf32, #tpu.memory_space<vmem>>, %arg9: memref<8x1xf32, #tpu.memory_space<vmem>>, %arg10: memref<8x1xf32, #tpu.memory_space<vmem>>, %arg11: memref<8x32xf32, #tpu.memory_space<vmem>>, %arg12: memref<8x32xf32, #tpu.memory_space<vmem>>) attributes {dimension_semantics = [#tpu.dimension_semantics<parallel>, #tpu.dimension_semantics<parallel>, #tpu.dimension_semantics<arbitrary>], iteration_bounds = array<i64: 2, 1, 1>, scalar_prefetch = 1 : i64, scratch_operands = 4 : i64, tpu.core_type = #tpu.core_type<tc>, window_params = [{transform_indices = @transform_0, window_bounds = array<i64: 1, 8, 32>}, {transform_indices = @transform_1, window_bounds = array<i64: 1, 8, 32>}, {transform_indices = @transform_2, window_bounds = array<i64: 1, 8, 32>}, {transform_indices = @transform_3, window_bounds = array<i64: 1, 8, 1>}, {transform_indices = @transform_4, window_bounds = array<i64: 1, 8, 32>}]} {
    %c1_i32 = arith.constant 1 : i32
    %0 = arith.muli %arg0, %c1_i32 : i32
    %1 = arith.addi %0, %arg1 : i32
    %2 = arith.index_cast %1 : i32 to index
    %3 = memref.load %arg3[%2] : memref<2xi32, #tpu.memory_space<smem>>
    %c0_i32 = arith.constant 0 : i32
    %4 = arith.cmpi eq, %arg2, %c0_i32 : i32
    %5 = arith.extui %4 : i1 to i32
    %c0_i32_0 = arith.constant 0 : i32
    %6 = arith.cmpi ne, %5, %c0_i32_0 : i32
    scf.if %6 {
      %c0 = arith.constant 0 : index
      %c0_2 = arith.constant 0 : index
      %c0_3 = arith.constant 0 : index
      %10 = vector.load %arg4[%c0, %c0_2, %c0_3] : memref<1x8x32xf32, #tpu.memory_space<vmem>>, vector<1x8x32xf32>
      %11 = vector.shape_cast %10 : vector<1x8x32xf32> to vector<8x32xf32>
      %cst = arith.constant 0.176776692 : f32
      %12 = vector.broadcast %cst : f32 to vector<8x32xf32>
      %13 = arith.mulf %11, %12 : vector<8x32xf32>
      %c0_4 = arith.constant 0 : index
      %c0_5 = arith.constant 0 : index
      %14 = vector.load %arg12[%c0_4, %c0_5] : memref<8x32xf32, #tpu.memory_space<vmem>>, vector<8x32xf32>
      tpu.vector_store %arg12[%c0_4, %c0_5], %13 {strides = array<i32>} : memref<8x32xf32, #tpu.memory_space<vmem>>, vector<8x32xf32>,
      %cst_6 = arith.constant -1.000000e+30 : f32
      %15 = vector.broadcast %cst_6 : f32 to vector<8x1xf32>
      %c0_7 = arith.constant 0 : index
      %c0_8 = arith.constant 0 : index
      %16 = vector.load %arg9[%c0_7, %c0_8] : memref<8x1xf32, #tpu.memory_space<vmem>>, vector<8x1xf32>
      tpu.vector_store %arg9[%c0_7, %c0_8], %15 {strides = array<i32>} : memref<8x1xf32, #tpu.memory_space<vmem>>, vector<8x1xf32>,
      %cst_9 = arith.constant 0.000000e+00 : f32
      %17 = vector.broadcast %cst_9 : f32 to vector<8x1xf32>
      %c0_10 = arith.constant 0 : index
      %c0_11 = arith.constant 0 : index
      %18 = vector.load %arg10[%c0_10, %c0_11] : memref<8x1xf32, #tpu.memory_space<vmem>>, vector<8x1xf32>
      tpu.vector_store %arg10[%c0_10, %c0_11], %17 {strides = array<i32>} : memref<8x1xf32, #tpu.memory_space<vmem>>, vector<8x1xf32>,
      %cst_12 = arith.constant 0.000000e+00 : f32
      %19 = vector.broadcast %cst_12 : f32 to vector<8x32xf32>
      %c0_13 = arith.constant 0 : index
      %c0_14 = arith.constant 0 : index
      %20 = vector.load %arg11[%c0_13, %c0_14] : memref<8x32xf32, #tpu.memory_space<vmem>>, vector<8x32xf32>
      tpu.vector_store %arg11[%c0_13, %c0_14], %19 {strides = array<i32>} : memref<8x32xf32, #tpu.memory_space<vmem>>, vector<8x32xf32>,
    } else {
    }
    %7 = arith.cmpi slt, %arg2, %3 : i32
    %8 = arith.extui %7 : i1 to i32
    %c0_i32_1 = arith.constant 0 : i32
    %9 = arith.cmpi ne, %8, %c0_i32_1 : i32
    scf.if %9 {
      %c0 = arith.constant 0 : index
      %c0_2 = arith.constant 0 : index
      %10 = vector.load %arg12[%c0, %c0_2] : memref<8x32xf32, #tpu.memory_space<vmem>>, vector<8x32xf32>
      %c0_3 = arith.constant 0 : index
      %c0_4 = arith.constant 0 : index
      %c0_5 = arith.constant 0 : index
      %11 = vector.load %arg5[%c0_3, %c0_4, %c0_5] : memref<1x8x32xf32, #tpu.memory_space<vmem>>, vector<1x8x32xf32>
      %12 = vector.shape_cast %11 : vector<1x8x32xf32> to vector<8x32xf32>
      %cst = arith.constant dense<0.000000e+00> : vector<8x8xf32>
      %13 = tpu.matmul %10, %12, %cst {dimension_numbers = #tpu.dot_dimension_numbers<[1], [1], [0], [0], [0, 0, 1, 0], [], []>} : vector<8x32xf32>, vector<8x32xf32>, vector<8x8xf32> -> vector<8x8xf32>
      %c8_i32 = arith.constant 8 : i32
      %14 = arith.muli %arg2, %c8_i32 : i32
      %15 = tpu.iota {dimensions = array<i32: 1>} : vector<1x8xi32>
      %16 = vector.broadcast %14 : i32 to vector<1x8xi32>
      %17 = arith.addi %16, %15 : vector<1x8xi32>
      %c0_6 = arith.constant 0 : index
      %c0_7 = arith.constant 0 : index
      %c0_8 = arith.constant 0 : index
      %18 = vector.load %arg7[%c0_6, %c0_7, %c0_8] : memref<1x8x1xi32, #tpu.memory_space<vmem>>, vector<1x8x1xi32>
      %19 = vector.shape_cast %18 : vector<1x8x1xi32> to vector<8x1xi32>
      %20 = vector.broadcast %17 : vector<1x8xi32> to vector<8x8xi32>
      %21 = vector.broadcast %19 : vector<8x1xi32> to vector<8x8xi32>
      %22 = arith.cmpi slt, %20, %21 : vector<8x8xi32>
      %cst_9 = arith.constant -1.000000e+06 : f32
      %23 = vector.broadcast %cst_9 : f32 to vector<8x8xf32>
      %24 = arith.select %22, %13, %23 : vector<8x8xi1>, vector<8x8xf32>
      %c0_10 = arith.constant 0 : index
      %c0_11 = arith.constant 0 : index
      %25 = vector.load %arg9[%c0_10, %c0_11] : memref<8x1xf32, #tpu.memory_space<vmem>>, vector<8x1xf32>
      %cst_12 = arith.constant dense<0xFF800000> : vector<8xf32>
      %26 = vector.multi_reduction <maximumf>, %24, %cst_12 [1] : vector<8x8xf32> to vector<8xf32>
      %27 = vector.shape_cast %26 : vector<8xf32> to vector<8x1xf32>
      %28 = arith.maximumf %25, %27 : vector<8x1xf32>
      %29 = arith.subf %25, %28 : vector<8x1xf32>
      %30 = math.exp %29 : vector<8x1xf32>
      %31 = vector.broadcast %28 : vector<8x1xf32> to vector<8x8xf32>
      %32 = arith.subf %24, %31 : vector<8x8xf32>
      %33 = math.exp %32 : vector<8x8xf32>
      %c0_13 = arith.constant 0 : index
      %c0_14 = arith.constant 0 : index
      %34 = vector.load %arg10[%c0_13, %c0_14] : memref<8x1xf32, #tpu.memory_space<vmem>>, vector<8x1xf32>
      %35 = arith.mulf %30, %34 : vector<8x1xf32>
      %cst_15 = arith.constant dense<0.000000e+00> : vector<8xf32>
      %36 = vector.multi_reduction <add>, %33, %cst_15 [1] : vector<8x8xf32> to vector<8xf32>
      %37 = vector.shape_cast %36 : vector<8xf32> to vector<8x1xf32>
      %38 = arith.addf %35, %37 : vector<8x1xf32>
      %c0_16 = arith.constant 0 : index
      %c0_17 = arith.constant 0 : index
      %39 = vector.load %arg10[%c0_16, %c0_17] : memref<8x1xf32, #tpu.memory_space<vmem>>, vector<8x1xf32>
      tpu.vector_store %arg10[%c0_16, %c0_17], %38 {strides = array<i32>} : memref<8x1xf32, #tpu.memory_space<vmem>>, vector<8x1xf32>,
      %c0_18 = arith.constant 0 : index
      %c0_19 = arith.constant 0 : index
      %40 = vector.load %arg11[%c0_18, %c0_19] : memref<8x32xf32, #tpu.memory_space<vmem>>, vector<8x32xf32>
      %41 = vector.broadcast %30 : vector<8x1xf32> to vector<8x32xf32>
      %42 = arith.mulf %41, %40 : vector<8x32xf32>
      %c0_20 = arith.constant 0 : index
      %c0_21 = arith.constant 0 : index
      %c0_22 = arith.constant 0 : index
      %43 = vector.load %arg6[%c0_20, %c0_21, %c0_22] : memref<1x8x32xf32, #tpu.memory_space<vmem>>, vector<1x8x32xf32>
      %44 = vector.shape_cast %43 : vector<1x8x32xf32> to vector<8x32xf32>
      %cst_23 = arith.constant dense<0.000000e+00> : vector<8x32xf32>
      %45 = tpu.matmul %33, %44, %cst_23 {dimension_numbers = #tpu.dot_dimension_numbers<[1], [0], [0], [1], [0, 0, 1, 1], [], []>} : vector<8x8xf32>, vector<8x32xf32>, vector<8x32xf32> -> vector<8x32xf32>
      %46 = arith.addf %42, %45 : vector<8x32xf32>
      %c0_24 = arith.constant 0 : index
      %c0_25 = arith.constant 0 : index
      %47 = vector.load %arg11[%c0_24, %c0_25] : memref<8x32xf32, #tpu.memory_space<vmem>>, vector<8x32xf32>
      tpu.vector_store %arg11[%c0_24, %c0_25], %46 {strides = array<i32>} : memref<8x32xf32, #tpu.memory_space<vmem>>, vector<8x32xf32>,
      %c0_26 = arith.constant 0 : index
      %c0_27 = arith.constant 0 : index
      %48 = vector.load %arg9[%c0_26, %c0_27] : memref<8x1xf32, #tpu.memory_space<vmem>>, vector<8x1xf32>
      tpu.vector_store %arg9[%c0_26, %c0_27], %28 {strides = array<i32>} : memref<8x1xf32, #tpu.memory_space<vmem>>, vector<8x1xf32>,
      %c1_i32_28 = arith.constant 1 : i32
      %49 = arith.subi %3, %c1_i32_28 : i32
      %50 = arith.cmpi eq, %arg2, %49 : i32
      %51 = arith.extui %50 : i1 to i32
      %c0_i32_29 = arith.constant 0 : i32
      %52 = arith.cmpi ne, %51, %c0_i32_29 : i32
      scf.if %52 {
        %c0_30 = arith.constant 0 : index
        %c0_31 = arith.constant 0 : index
        %53 = vector.load %arg11[%c0_30, %c0_31] : memref<8x32xf32, #tpu.memory_space<vmem>>, vector<8x32xf32>
        %c0_32 = arith.constant 0 : index
        %c0_33 = arith.constant 0 : index
        %54 = vector.load %arg10[%c0_32, %c0_33] : memref<8x1xf32, #tpu.memory_space<vmem>>, vector<8x1xf32>
        %55 = tpu.reciprocal %54 : vector<8x1xf32> -> vector<8x1xf32>
        %56 = vector.broadcast %55 : vector<8x1xf32> to vector<8x32xf32>
        %57 = arith.mulf %53, %56 : vector<8x32xf32>
        %c0_34 = arith.constant 0 : index
        %c0_35 = arith.constant 0 : index
        %c0_36 = arith.constant 0 : index
        %58 = vector.load %arg8[%c0_34, %c0_35, %c0_36] : memref<1x8x32xf32, #tpu.memory_space<vmem>>, vector<1x8x32xf32>
        %59 = vector.shape_cast %58 : vector<1x8x32xf32> to vector<8x32xf32>
        %60 = vector.shape_cast %57 : vector<8x32xf32> to vector<1x8x32xf32>
        tpu.vector_store %arg8[%c0_34, %c0_35, %c0_36], %60 {strides = array<i32>} : memref<1x8x32xf32, #tpu.memory_space<vmem>>, vector<1x8x32xf32>,
      } else {
      }
    } else {
    }
    return
  }
  func.func @transform_0(%arg0: i32, %arg1: i32, %arg2: i32, %arg3: memref<2xi32, #tpu.memory_space<smem>>) -> (i32, i32, i32) {
    %c0_i32 = arith.constant 0 : i32
    %c0_i32_0 = arith.constant 0 : i32
    return %arg0, %arg1, %c0_i32 : i32, i32, i32
  }
  func.func @transform_1(%arg0: i32, %arg1: i32, %arg2: i32, %arg3: memref<2xi32, #tpu.memory_space<smem>>) -> (i32, i32, i32) {
    %c1_i32 = arith.constant 1 : i32
    %0 = arith.muli %arg0, %c1_i32 : i32
    %1 = arith.addi %0, %arg1 : i32
    %2 = arith.index_cast %1 : i32 to index
    %3 = memref.load %arg3[%2] : memref<2xi32, #tpu.memory_space<smem>>
    %c1_i32_0 = arith.constant 1 : i32
    %4 = arith.subi %3, %c1_i32_0 : i32
    %5 = arith.minsi %arg2, %4 : i32
    %c0_i32 = arith.constant 0 : i32
    %c0_i32_1 = arith.constant 0 : i32
    return %arg0, %5, %c0_i32 : i32, i32, i32
  }
  func.func @transform_2(%arg0: i32, %arg1: i32, %arg2: i32, %arg3: memref<2xi32, #tpu.memory_space<smem>>) -> (i32, i32, i32) {
    %c1_i32 = arith.constant 1 : i32
    %0 = arith.muli %arg0, %c1_i32 : i32
    %1 = arith.addi %0, %arg1 : i32
    %2 = arith.index_cast %1 : i32 to index
    %3 = memref.load %arg3[%2] : memref<2xi32, #tpu.memory_space<smem>>
    %c1_i32_0 = arith.constant 1 : i32
    %4 = arith.subi %3, %c1_i32_0 : i32
    %5 = arith.minsi %arg2, %4 : i32
    %c0_i32 = arith.constant 0 : i32
    %c0_i32_1 = arith.constant 0 : i32
    return %arg0, %5, %c0_i32 : i32, i32, i32
  }
  func.func @transform_3(%arg0: i32, %arg1: i32, %arg2: i32, %arg3: memref<2xi32, #tpu.memory_space<smem>>) -> (i32, i32, i32) {
    %c0_i32 = arith.constant 0 : i32
    %c0_i32_0 = arith.constant 0 : i32
    return %arg0, %arg1, %c0_i32 : i32, i32, i32
  }
  func.func @transform_4(%arg0: i32, %arg1: i32, %arg2: i32, %arg3: memref<2xi32, #tpu.memory_space<smem>>) -> (i32, i32, i32) {
    %c0_i32 = arith.constant 0 : i32
    %c0_i32_0 = arith.constant 0 : i32
    return %arg0, %arg1, %c0_i32 : i32, i32, i32
  }
}

</mosaic_0001>

<bundles_post_ra>
// kernel: tpu_custom_call.1
= control target key start
LH: loop header
LB: loop body
LE: loop exit
PB: predicated region body
PF: predicated region fallthrough
CT: control target
= control target key end

     0   :  { %s1547_s0 = inlined_call_operand.vmem [shape: s32[2], index: 0, kind: input, shape index: {}]   ;;  %s1548_s1 = inlined_call_operand.vmem [shape: f32[2,8,32], index: 1, kind: input, shape index: {}]   ;;  %s1549_s2 = inlined_call_operand.hbm [shape: f32[2,8,32], index: 2, kind: input, shape index: {}]   ;;  %s1550_s3 = inlined_call_operand.hbm [shape: f32[2,8,32], index: 3, kind: input, shape index: {}]   ;;  %s1551_s4 = inlined_call_operand.vmem [shape: s32[2,8,1], index: 4, kind: input, shape index: {}]   ;;  %s1552_s5 = inlined_call_operand.hbm [shape: f32[2,8,32], index: 5, kind: output, shape index: {}]  }
   0x1   :  { %1568 = sst [smem:[#allocation30_spill]] %s1548_s1  ;;  %s10_s20 = sshll.u32 %s1547_s0, 4  ;;  %s11_s20 = int_to_ptr.vmem [resolvable:$true] %s10_s20 }
   0x2   :  { %1569 = sst [smem:[#allocation31_spill]] %s1551_s4  ;;  %s955_s21 = scalar_lea.vmem %s11_s20, 16 }
   0x3   :  { %1570 = sst [smem:[#allocation32_spill]] %s1552_s5  ;;  %p956_p0 = scmp.ne.s32.totalorder %s11_s20, %s955_s21 }
   0x4   :  { %p960_p1 = scmp.lt.s32.totalorder %s11_s20, %s11_s20  ;;  %p961_p2 = scmp.lt.s32.totalorder %s955_s21, %s955_s21 }
   0x6   :  { %p962_p3 = por %p961_p2, %p960_p1 }
   0x8   :  { %p963_p4 = pnand %p962_p3, %p956_p0 }
   0xa   :  { %966 = shalt.err (!%p963_p4)  }
   0xb   :  { %s1159_s22 = smov [#allocation7]  }
   0xc   :  { %13 = dma.vmem_to_smem %s11_s20, 16, %s1159_s22, [#allocation6] }
   0xd   :  { %1097 = dma.done.wait [#allocation6], 16 }
   0xe   :  { %1098 = vsyncadd [#allocation6], 4294967280 }
   0xf   :  { %15 = sfence }
  0x10   :  { %16 = vsyncpa [#allocation9], 0 }
  0x11   :  { %18 = vsyncpa [#allocation9 + $0x1], 0 }
  0x12   :  { %19 = vsyncpa [#allocation12], 0 }
  0x13   :  { %21 = vsyncpa [#allocation12 + $0x1], 0 }
  0x14   :  { %22 = vsyncpa [#allocation10], 0 }
  0x15   :  { %24 = vsyncpa [#allocation10 + $0x1], 0  ;;  %s1202_s0 = smov 0   ;;  %s1204_s23 = smov 0  }
  0x16   :  { %s1206_s24 = smov 0   ;;  %s1208_s25 = smov 0  }
  0x17   :  { %s1210_s26 = smov 0   ;;  %s1212_s27 = smov 0  }
  0x18   :  { %s1214_s28 = smov 0   ;;  %s1216_s29 = smov 0  }
  0x19   :  { %s1218_s30 = smov 0   ;;  %s1220_s6 = smov 0  }
  0x1a   :  { %s1222_s7 = smov 0   ;;  %s1224_s8 = smov 0  }
  0x1b LB: > { %1571 = sst [smem:[#allocation22_spill]] %s1113_s0  ;;  %s764_s9 = sadd.s32 4294967295, %s1157_s8   ;;  %s1157_s8 = sphi %s1224_s8, %s30_s8   ;;  %s1153_s7 = sphi %s1222_s7, %s1623_s7   ;;  %s1149_s6 = sphi %s1220_s6, %s1622_s6   ;;  %s1145_s30 = sphi %s1218_s30, %s1621_s30   ;;  %s1141_s29 = sphi %s1216_s29, %s1620_s29   ;;  %s1137_s28 = sphi %s1214_s28, %s1619_s28   ;;  %s1133_s27 = sphi %s1212_s27, %s1618_s27   ;;  %s1129_s26 = sphi %s1210_s26, %s1617_s26   ;;  %s1125_s25 = sphi %s1208_s25, %s1616_s25   ;;  %s1121_s24 = sphi %s1206_s24, %s1611_s24   ;;  %s1117_s23 = sphi %s1204_s23, %s1615_s23   ;;  %s1113_s0 = sphi %s1202_s0, %s1614_s0  }
  0x1c   : > { %1572 = sst [smem:[#allocation23_spill]] %s1121_s24  ;;  %s49_s10 = sadd.s32 1, %s1153_s7 }
  0x1d   : > { %1573 = sst [smem:[#allocation24_spill]] %s1149_s6  ;;  %s765_s12 = sadd.s32 4294967294, %s1157_s8  }
  0x1e   : > { %s82_s11 = sld [smem:[#allocation7 + %s1153_s7]]  ;;  %p51_p5 = scmp.ge.s32.totalorder %s49_s10, 2 }
  0x1f   : > { %s96_s13 = sadd.s32 1, %s1145_s30  ;;  %p103_p6 = scmp.ne.s32.totalorder %s1145_s30, %s1141_s29 }
  0x20   : > { %s1625_s10 = smov (%p51_p5, %s49_s10), 0  ;;  %p1564_p7 = scmp.eq.s32.totalorder %s1157_s8, 0 }
  0x21   : > { %1574 = sst [smem:[#allocation25_spill]] %s1625_s10  ;;  %p109_p8 = scmp.ne.s32.totalorder %s1141_s29, %s1137_s28 }
  0x22   : > { %s87_s14 = sld [smem:[#allocation7 + %s1625_s10]]  ;;  %s1274_s15 = ssub.s32 %s1153_s7, %s1625_s10 }
  0x23   : > { %p1276_p9 = scmp.eq.s32.totalorder %s764_s9, 0  ;;  %p188_p11 = scmp.eq.s32.totalorder %s1274_s15, 0 }
  0x24   : > { %s766_s16 = sadd.s32 4294967295, %s82_s11  ;;  %s190_s19 = sadd.s32 1, %s1121_s24 }
  0x25   : > { %p767_p10 = scmp.gt.s32.totalorder %s766_s16, 0  ;;  %p1283_p12 = por %p1276_p9, %p109_p8 }
  0x26   : > { %s1289_s20 = scalar_select %p188_p11, %s1121_s24, %s190_s19  }
  0x27   : > { %s1576_s18 = scalar_select %p1283_p12, 1, 0 }
  0x28   : > { %s1627_s16 = smov (%p767_p10, %s766_s16), 0  ;;  %1577 = sst [smem:[#allocation26_spill]] %s1289_s20 }
  0x29   : > { %s768_s21 = sadd.s32 4294967295, %s87_s14  ;;  %p200_p13 = scmp.ne.s32.totalorder %s1121_s24, %s1117_s23 }
  0x2a   : > { %p769_p0 = scmp.gt.s32.totalorder %s768_s21, 0  ;;  %p201_p1 = scmp.eq.s32.totalorder %s764_s9, 1 }
  0x2b   : > { %p206_p2 = scmp.ne.s32.totalorder %s1117_s23, %s1113_s0  ;;  %p207_p3 = scmp.eq.s32.totalorder %s765_s12, 1 }
  0x2c   : > { %s1629_s21 = smov (%p769_p0, %s768_s21), 0  ;;  %p1295_p4 = por %p201_p1, %p200_p13 }
  0x2d   : > { %p1299_p5 = por %p207_p3, %p206_p2  ;;  %s92_s11 = ssub.s32 %s1627_s16, %s1629_s21 }
  0x2e   : > { %s1578_s22 = scalar_select %p1295_p4, 1, 0 }
  0x2f   : > { %s1580_s28 = scalar_select %p1299_p5, 1, 0 }
  0x30   : > { %1579 = sst [smem:[#allocation27_spill]] %s1578_s22  ;;  %s93_s14 = sor.u32 %s92_s11, %s1274_s15 }
  0x31   : > { %1581 = sst [smem:[#allocation28_spill]] %s1580_s28  ;;  %p105_p10 = por %p1564_p7, %p103_p6 }
  0x32   : > { %p94_p11 = scmp.eq.s32.totalorder %s93_s14, 0  ;;  %s1553_s9 = sand.u32 1, %s1145_s30  }
  0x33   : > { %p1563_p0 = scmp.lt.s32.totalorder %s1157_s8, 2  ;;  %s776_s19 = sshll.u32 %s1553_s9, 3 }
  0x34   : > { %s1315_s12 = scalar_select %p94_p11, %s1145_s30, %s96_s13  }
  0x35   : > { %p1321_p13 = pnand %p1563_p0, %p105_p10  ;;  %p784_p6 = scmp.ge.s32.totalorder %s1157_s8, 1 }
  0x36   : > { %1582 = sst [smem:[#allocation29_spill]] %s1315_s12  ;;  %p293_p1 = scmp.lt.s32.totalorder %s1157_s8, 3 }
  0x37   : > { %s816_s16 = scalar_select %p105_p10, [#allocation7], [#allocation14] }
  0x38   : > { %s817_s21 = scalar_select %p105_p10, %s1153_s7, 0 }
  0x39   : > { %s1631_s16 = smov (!%p1563_p0, %s816_s16), [#allocation16]  ;;  %s241_s11 = scalar_lea.vmem [#allocation8], %s776_s19 }
  0x3a   : > { %s1633_s21 = smov (!%p1563_p0, %s817_s21), 0  ;;  %s254_s14 = sshll.u32 %s241_s11, 4  ;;  %s1342_s14 = int_to_ptr.vmem [resolvable:$true] %s254_s14 }
  0x3b   : > { %s243_s13 = sld [smem:[%s1631_s16 + %s1633_s21]]  ;;  %p1332_p2 = pnand %p784_p6, %p293_p1 }
  0x3c   : > { %s1337_s12 = sld [smem:[#allocation7 + %s1153_s7]]  ;;  %p147_p10 = scmp.ne.s32.totalorder %s1129_s26, %s1125_s25 }
  0x3d   : > { %s1584_s9 = scalar_select %p1332_p2, 1, 0 }
  0x3e   : > { %s1340_s28 = sld [smem:[#allocation7 + %s1625_s10]]  ;;  %p1350_p6 = por %p147_p10, %p1276_p9 }
  0x3f   : > { %s1587_s22 = sand.u32 1, %s1145_s30  }
  0x40   : > { %s1585_s19 = scalar_select %p1350_p6, 1, 0 }
  0x41   : > { %s777_s24 = sadd.s32 4294967295, %s243_s13  ;;  %s238_s4 = scalar_lea.sflag [#allocation9], %s1587_s22 }
  0x42   : > { %p778_p3 = scmp.gt.s32.totalorder %s777_s24, 0  ;;  %s1561_s21 = sadd.s32 4294967295, %s1337_s12 }
  0x43   : > { %p1358_p1 = scmp.gt.s32.totalorder %s1561_s21, 0  ;;  %s972_s21 = scalar_lea.hbm %s1549_s2, 256 }
  0x44   : > { %s1635_s24 = smov (%p778_p3, %s777_s24), 0  ;;  %s772_s25 = sadd.s32 4294967295, %s1340_s28 }
  0x45   : > { %s250_s16 = sadd.s32 %s1153_s7, %s1635_s24  ;;  %p969_p3 = pneg %p1321_p13 }
  0x46   : > { %s779_s11 = sshll.u32 %s250_s16, 7 }
  0x47   : > { %s1586_s13 = scalar_select %p1358_p1, 1, 0 }
  0x48   : > { %s252_s5 = scalar_lea.hbm %s1549_s2, %s779_s11 }
  0x49   : > { %s967_s17 = scalar_lea.hbm %s252_s5, 128  ;;  %p973_p0 = scmp.lt.s32.totalorder %s252_s5, %s1549_s2 }
  0x4a   : > { %p968_p9 = scmp.ne.s32.totalorder %s252_s5, %s967_s17  ;;  %p974_p11 = scmp.lt.s32.totalorder %s972_s21, %s967_s17 }
  0x4c   : > { %p970_p10 = pnand %p969_p3, %p968_p9  ;;  %p975_p7 = por %p974_p11, %p973_p0 }
  0x4e   : > { %p971_p8 = pneg %p970_p10 }
  0x50   : > { %p976_p5 = pnand %p975_p7, %p971_p8 }
  0x52   : > { %979 = shalt.err (!%p976_p5)
}
  0x53   : > { %s980_s0 = scalar_lea.vmem %s1342_s14, 128  ;;  %s1160_s10 = smov [#allocation8]  }
  0x54   : > { %p981_p4 = scmp.ne.s32.totalorder %s1342_s14, %s980_s0  ;;  %s985_s22 = sshll.u32 %s1160_s10, 4  ;;  %s986_s22 = int_to_ptr.vmem [resolvable:$false] %s985_s22 }
  0x55   : > { %s987_s11 = scalar_lea.vmem %s986_s22, 256  ;;  %p988_p10 = scmp.lt.s32.totalorder %s1342_s14, %s986_s22 }
  0x56   : > { %p983_p6 = pnand %p981_p4, %p969_p3  ;;  %p989_p12 = scmp.lt.s32.totalorder %s987_s11, %s980_s0 }
  0x58   : > { %p984_p9 = pneg %p983_p6  ;;  %p990_p2 = por %p989_p12, %p988_p10 }
  0x5a   : > { %p991_p1 = pnand %p990_p2, %p984_p9 }
  0x5c   : > { %994 = shalt.err (!%p991_p1)
}
  0x5d   : > { %831 = dma.hbm_to_vmem [thread:$0]  (!%p1321_p13), %s252_s5, 128, %s1342_s14, %s238_s4  }
  0x5e   : > { %s1588_s1 = sadd.s32 4294967295, %s1337_s12  ;;  %p1589_p7 = scmp.ne.s32.totalorder %s1586_s13, 0 }
  0x5f   : > { %p773_p12 = scmp.gt.s32.totalorder %s772_s25, 0  ;;  %p1590_p4 = scmp.eq.s32.totalorder %s1157_s8, 0 }
  0x60   : > { %s1637_s1 = smov (%p1589_p7, %s1588_s1), 0  ;;  %p1591_p5 = scmp.ne.s32.totalorder %s1133_s27, %s1129_s26 }
  0x61   : > { %s1639_s25 = smov (%p773_p12, %s772_s25), 0  ;;  %p1592_p0 = scmp.lt.s32.totalorder %s1157_s8, 2 }
  0x62   : > { %p143_p8 = por %p1591_p5, %p1590_p4  ;;  %s130_s20 = ssub.s32 %s1637_s1, %s1639_s25 }
  0x63   : > { %s131_s21 = sor.u32 %s130_s20, %s1274_s15  ;;  %s134_s17 = sadd.s32 1, %s1133_s27 }
  0x64   : > { %p1397_p2 = pnand %p1592_p0, %p143_p8  ;;  %p132_p13 = scmp.eq.s32.totalorder %s131_s21, 0 }
  0x65   : > { %s819_s4 = scalar_select %p143_p8, [#allocation7], [#allocation15] }
  0x66   : > { %s1404_s5 = scalar_select %p132_p13, %s1133_s27, %s134_s17  }
  0x67   : > { %s820_s12 = scalar_select %p143_p8, %s1153_s7, 0 }
  0x68   : > { %p1594_p11 = pmov %p1592_p0  ;;  %p1595_p6 = pmov %p1592_p0 }
  0x69   : > { %s261_s28 = sand.u32 1, %s1133_s27   ;;  %p997_p9 = pneg %p1397_p2 }
  0x6a   : > { %s1641_s4 = smov (!%p1594_p11, %s819_s4), [#allocation17]  ;;  %s1643_s12 = smov (!%p1595_p6, %s820_s12), 0 }
  0x6b   : > { %s267_s14 = sld [smem:[%s1641_s4 + %s1643_s12]]  ;;  %s780_s13 = sshll.u32 %s261_s28, 3 }
  0x6c   : > { %s265_s16 = scalar_lea.vmem [#allocation11], %s780_s13  ;;  %s262_s1 = scalar_lea.sflag [#allocation12], %s261_s28 }
  0x6d   : > { %s278_s25 = sshll.u32 %s265_s16, 4  ;;  %s1000_s4 = scalar_lea.hbm %s1550_s3, 256  ;;  %s1413_s25 = int_to_ptr.vmem [resolvable:$true] %s278_s25 }
  0x71   : > { %s781_s24 = sadd.s32 4294967295, %s267_s14 }
  0x72   : > { %p782_p1 = scmp.gt.s32.totalorder %s781_s24, 0 }
  0x74   : > { %s1645_s24 = smov (%p782_p1, %s781_s24), 0 }
  0x75   : > { %s274_s15 = sadd.s32 %s1153_s7, %s1645_s24 }
  0x76   : > { %s783_s0 = sshll.u32 %s274_s15, 7 }
  0x77   : > { %s276_s11 = scalar_lea.hbm %s1550_s3, %s783_s0 }
  0x78   : > { %s995_s20 = scalar_lea.hbm %s276_s11, 128  ;;  %p1001_p12 = scmp.lt.s32.totalorder %s276_s11, %s1550_s3 }
  0x79   : > { %p996_p3 = scmp.ne.s32.totalorder %s276_s11, %s995_s20  ;;  %p1002_p4 = scmp.lt.s32.totalorder %s1000_s4, %s995_s20 }
  0x7b   : > { %p998_p10 = pnand %p997_p9, %p996_p3  ;;  %p1003_p5 = por %p1002_p4, %p1001_p12 }
  0x7d   : > { %p999_p7 = pneg %p998_p10 }
  0x7f   : > { %p1004_p8 = pnand %p1003_p5, %p999_p7 }
  0x81   : > { %1007 = shalt.err (!%p1004_p8)
}
  0x82   : > { %s1008_s28 = scalar_lea.vmem %s1413_s25, 128  ;;  %s1161_s13 = smov [#allocation11]  }
  0x83   : > { %p1009_p0 = scmp.ne.s32.totalorder %s1413_s25, %s1008_s28  ;;  %s1013_s24 = sshll.u32 %s1161_s13, 4  ;;  %s1014_s24 = int_to_ptr.vmem [resolvable:$false] %s1013_s24 }
  0x84   : > { %s1015_s16 = scalar_lea.vmem %s1014_s24, 256  ;;  %p1016_p6 = scmp.lt.s32.totalorder %s1413_s25, %s1014_s24 }
  0x85   : > { %p1011_p13 = pnand %p1009_p0, %p997_p9  ;;  %p1017_p1 = scmp.lt.s32.totalorder %s1015_s16, %s1008_s28 }
  0x87   : > { %p1012_p11 = pneg %p1011_p13  ;;  %p1018_p3 = por %p1017_p1, %p1016_p6 }
  0x89   : > { %p1019_p10 = pnand %p1018_p3, %p1012_p11 }
  0x8b   : > { %1022 = shalt.err (!%p1019_p10)
}
  0x8c   : > { %836 = dma.hbm_to_vmem [thread:$0]  (!%p1397_p2), %s276_s11, 128, %s1413_s25, %s262_s1  }
  0x8d   : > { %p1596_p7 = scmp.ne.s32.totalorder %s1584_s9, 0 }
  0x8e   : > { %s299_s15 = sand.u32 (!%p1596_p7), 1, %s1141_s29   ;;  %p1597_p9 = scmp.ne.s32.totalorder (!%p1596_p7), %s1576_s18, 0 }
  0x8f   : > { %297 = sbr.rel (%p1596_p7) target bundleno = 1019 (0x3fb), region = 36  ;;  %s1435_s0 = sshll.u32 (!%p1596_p7), %s299_s15, 3 }
  0x90   : > { %s300_s10 = scalar_lea.sflag (!%p1596_p7), [#allocation9], %s299_s15  ;;  %s303_s22 = scalar_lea.vmem (!%p1596_p7), [#allocation8], %s1435_s0 }
  0x94   : > { %1100 = dma.done.wait (%p1597_p9), %s300_s10, 128  }
  0x95   : > { %1102 = vsyncadd (%p1597_p9), %s300_s10, 4294967168  ;;  %s308_s6 = sand.u32 1, %s1129_s26   ;;  %p1598_p2 = scmp.ne.s32.totalorder %s1585_s19, 0 }
  0x96   : > { %s1443_s25 = sshll.u32 %s308_s6, 3  ;;  %s309_s9 = scalar_lea.sflag [#allocation12], %s308_s6 }
  0x97   : > { %s312_s11 = scalar_lea.vmem [#allocation11], %s1443_s25 }
  0x98   : > { %1104 = dma.done.wait (%p1598_p2), %s309_s9, 128  }
  0x99   : > { %1106 = vsyncadd (%p1598_p2), %s309_s9, 4294967168  ;;  %s1599_s1 = sld [smem:[#allocation24_spill]]  ;;  %s353_s18 = sand.u32 1, %s1117_s23   ;;  %vm388_vm0 = vcmask 261120   ;;  %vm390_vm1 = vcmask 7168   ;;  %v1162_v0 = vmov 0.0  }
  0x9a   : > { %s1457_s21 = sshll.u32 %s353_s18, 3  ;;  %392 = vst.msk [vmem:[#allocation3] sm:$0xff] %vm390_vm1, %v1162_v0  ;;  %v1163_v1 = vmov -1e+30   ;;  %s1600_s12 = sld [smem:[#allocation30_spill]] }
  0x9b   : > { %393 = vst.msk [vmem:[#allocation4] sm:$0xff] %vm388_vm0, %v1162_v0  ;;  %s1601_s24 = sld [smem:[#allocation31_spill]]  ;;  %s355_s15 = scalar_lea.vmem [#allocation13], %s1457_s21 }
  0x9c   : > { %391 = vst.msk [vmem:[#allocation2] sm:$0xff] %vm390_vm1, %v1163_v1 }
  0x9f   : > { %p356_p12 = scmp.lt.s32.totalorder %s1599_s1, 1  ;;  %s1453_s20 = sld [smem:[#allocation7 + %s1599_s1]] }
  0xa1   : > { %s1647_s1 = smov (!%p356_p12, %s1599_s1), 1 }
  0xa2   : > { %s788_s19 = sshll.u32 %s1647_s1, 3 }
  0xa3   : > { %s362_s14 = scalar_lea.vmem %s1600_s12, %s788_s19  ;;  %s379_s16 = scalar_lea.vmem %s1601_s24, %s788_s19 }
  0xa4   : > { %v386_v2 = vld [vmem:[%s362_s14] sm:$0xff] }
  0xa5   : > { %v387_v3 = vmul.f32 0.17677669, %v386_v2  ;;  %p791_p4 = scmp.le.s32.totalorder %s1453_s20, 0 }
  0xa6   : > { %s795_s0 = sadd.s32 (!%p791_p4), 4294967295, %s1453_s20 }
  0xa7   : > { %389 = vst.msk [vmem:[#allocation5] sm:$0xff] %vm388_vm0, %v387_v3  ;;  %397 = sbr.rel (%p791_p4) target bundleno = 992 (0x3e0), region = 52  ;;  %p797_p5 = scmp.ne.s32.totalorder (!%p791_p4), %s795_s0, 0 }
  0xac   : > { %v399_v4 = vld [vmem:[%s303_s22] sm:$0xff]  ;;  %v1164_v6 = vmov 0.0   ;;  %vm1165_vm2 = vmmov 0   ;;  %v1166_v8 = vmov 0   ;;  %v478_v9 = vlaneseq  ;;  %v520_v20 = vld [vmem:[%s312_s11] sm:$0xff] }
  0xad   : > { %v482_v5 = vld [vmem:[%s379_s16] sm:$0xff]  ;;  %806 = vmatprep.subr.mxu0 %v1164_v6  ;;  %808 = vmatprep.mubr.msk.f32.mxu0 %vm1165_vm2, %v1164_v6  ;;  %vm489_vm4 = vcmask 64512   ;;  %v505_v28 = vld [vmem:[#allocation3] sm:$0xff]  ;;  %v513_v32 = vld [vmem:[#allocation4] sm:$0xff] }
  0xae   : > { %807 = vmatpush3.xpose.msk.msra.mxu0 %vm388_vm0, %v399_v4  ;;  %v398_v7 = vld [vmem:[#allocation5] sm:$0xff]  ;;  %946 = vset.pattern.permute.xlu0 %v1166_v8  ;;  %v479_v10 = vand.u32 127, %v478_v9  ;;  %v488_v16 = vld [vmem:[#allocation2] sm:$0xff] }
  0xaf   : > { %484 = vperm.xlu0 %946, %v482_v5   ;;  %947 = vset.pattern.permute.xlu1 %v1166_v8 }
  0xb0   : > { %811 = vmatprep.subr.mxu1 %v1164_v6  ;;  %813 = vmatprep.mubr.msk.f32.mxu1 %vm1165_vm2, %v1164_v6 }
  0xb1   : > { %809 = vmatmul.mubr.msk.f32.vlgmr.msra.gmra.mxu0 %vm388_vm0, %v398_v7  ;;  %812 = vmatpush3.msra.mxu1 %v520_v20 }
 0x12a   : > { %v485_v11 = vpop.permute.xlu0 %484 }
 0x12b   : > { %vm486_vm3 = vcmp.lt.s32.totalorder %v479_v10, %v485_v11 }
 0x171   : > { %v473_v12 = vpop.f32.mrf.mxu0 }
 0x172   : > { %v487_v13 = vsel %vm486_vm3, %v473_v12, -1000000.0 }
 0x173   : > { %v810_v14 = vpop.f32.mrf.mxu0  ;;  %v490_v15 = vsel %vm489_vm4, %v487_v13, -inf }
 0x174   : > { %491 = vmax.xlane.f32.xlu0 %v490_v15 }
 0x1fd   : > { %v492_v17 = vpop.xlane.xlu0 %491 }
 0x1fe   : > { %v493_v18 = vmax.f32 %v488_v16, %v492_v17 }
 0x200   : > { %v494_v19 = vsub.f32 %v488_v16, %v493_v18  ;;  %596 = vst.msk [vmem:[#allocation2] sm:$0xff] %vm390_vm1, %v493_v18  ;;  %499 = vperm.xlu1 %947, %v493_v18  }
 0x202   : > { %v495_v21 = vmul.f32 1.442695, %v494_v19 }
 0x204   : > { %948 = vpow2.f32 %v495_v21 }
 0x211   : > { %v949_v22 = vpop.eup %948 }
 0x212   : > { %516 = vperm.xlu0 %946, %v949_v22   ;;  %v506_v29 = vmul.f32 %v949_v22, %v505_v28 }
 0x27b   : > { %v500_v23 = vpop.permute.xlu1 %499 }
 0x27c   : > { %v502_v24 = vsub.f32 %v487_v13, %v500_v23 }
 0x27e   : > { %v503_v25 = vmul.f32 1.442695, %v502_v24 }
 0x280   : > { %950 = vpow2.f32 %v503_v25 }
 0x28d   : > { %v951_v26 = vpop.eup %950  ;;  %v517_v33 = vpop.permute.xlu0 %516 }
 0x28e   : > { %814 = vmatmul.mubr.msk.f32.vlgmr.msra.gmra.mxu1 %vm489_vm4, %v951_v26  ;;  %v507_v27 = vsel %vm489_vm4, %v951_v26, 0.0  ;;  %v519_v34 = vmul.f32 %v517_v33, %v513_v32 }
 0x28f   : > { %508 = vadd.xlane.f32.xlu1 %v507_v27 }
 0x318   : > { %v509_v30 = vpop.xlane.xlu1 %508 }
 0x319   : > { %v510_v31 = vadd.f32 %v509_v30, %v506_v29 }
 0x31b   : > { %512 = vst.msk [vmem:[#allocation3] sm:$0xff] %vm390_vm1, %v510_v31 }
 0x34d   : > { %601 = sbr.rel (%p797_p5) target bundleno = 992 (0x3e0), region = 56 }
 0x34e   : > { %v590_v35 = vpop.f32.mrf.mxu1 }
 0x34f   : > { %v594_v36 = vadd.f32 %v590_v35, %v519_v34 }
 0x350   : > { %v815_v37 = vpop.f32.mrf.mxu1 }
 0x351   : > { %595 = vst.msk [vmem:[#allocation4] sm:$0xff] %vm388_vm0, %v594_v36 }
 0x352   : > { %v603_v38 = vld [vmem:[#allocation3] sm:$0xff]  ;;  %v1167_v39 = vmov 0  }
 0x353   : > { %952 = vset.pattern.permute.xlu0 %v1167_v39  ;;  %953 = vrcp.f32 %v603_v38 }
 0x358   : > { %v602_v41 = vld [vmem:[#allocation4] sm:$0xff] }
 0x360   : > { %v954_v40 = vpop.eup %953 }
 0x361   : > { %607 = vperm.xlu0 %952, %v954_v40  }
 0x3dc   : > { %v608_v42 = vpop.permute.xlu0 %607 }
 0x3dd   : > { %v610_v43 = vmul.f32 %v608_v42, %v602_v41 }
 0x3df   : > { %611 = vst.msk [vmem:[%s355_s15] sm:$0xff] %vm388_vm0, %v610_v43 }
 0x3e0 PF: > { %s1602_s10 = sld [smem:[#allocation24_spill]]  ;;  %s627_s20 = sshll.u32 %s355_s15, 4  ;;  %s628_s20 = int_to_ptr.vmem [resolvable:$true] %s627_s20 }
 0x3e1   : > { %s1603_s22 = sld [smem:[#allocation27_spill]]  ;;  %s613_s19 = scalar_lea.sflag [#allocation10], %s353_s18 }
 0x3e2   : > { %s1604_s11 = sld [smem:[#allocation32_spill]]  ;;  %s1023_s17 = scalar_lea.vmem %s628_s20, 128 }
 0x3e3   : > { %p1024_p8 = scmp.ne.s32.totalorder %s628_s20, %s1023_s17  ;;  %s1168_s4 = smov [#allocation13]  }
 0x3e4   : > { %s1027_s12 = sshll.u32 %s1168_s4, 4  ;;  %s1028_s12 = int_to_ptr.vmem [resolvable:$false] %s1027_s12 }
 0x3e5   : > { %s1029_s14 = scalar_lea.vmem %s1028_s12, 256  ;;  %p1030_p6 = scmp.lt.s32.totalorder %s628_s20, %s1028_s12 }
 0x3e6   : > { %s799_s6 = sshll.u32 %s1602_s10, 7  ;;  %p1031_p1 = scmp.lt.s32.totalorder %s1029_s14, %s1023_s17 }
 0x3e7   : > { %p1605_p0 = scmp.ne.s32.totalorder %s1603_s22, 0 }
 0x3e8   : > { %s625_s1 = scalar_lea.hbm %s1604_s11, %s799_s6  ;;  %p1032_p3 = por %p1031_p1, %p1030_p6 }
 0x3e9   : > { %p1025_p13 = pnand %p1024_p8, %p1605_p0 }
 0x3eb   : > { %p1026_p11 = pneg %p1025_p13 }
 0x3ed   : > { %p1033_p10 = pnand %p1032_p3, %p1026_p11 }
 0x3ef   : > { %1036 = shalt.err (!%p1033_p10)
}
 0x3f0   : > { %s1037_s28 = scalar_lea.hbm %s625_s1, 128  ;;  %s1041_s13 = scalar_lea.hbm %s1604_s11, 256 }
 0x3f1   : > { %p1038_p7 = scmp.ne.s32.totalorder %s625_s1, %s1037_s28  ;;  %p1042_p12 = scmp.lt.s32.totalorder %s625_s1, %s1604_s11 }
 0x3f2   : > { %p1043_p4 = scmp.lt.s32.totalorder %s1041_s13, %s1037_s28 }
 0x3f3   : > { %p1039_p9 = pnand %p1038_p7, %p1605_p0 }
 0x3f4   : > { %p1044_p5 = por %p1043_p4, %p1042_p12 }
 0x3f5   : > { %p1040_p2 = pneg %p1039_p9 }
 0x3f7   : > { %p1045_p8 = pnand %p1044_p5, %p1040_p2 }
 0x3f9   : > { %1048 = shalt.err (!%p1045_p8)
}
 0x3fa   : > { %824 = dma.vmem_to_hbm [thread:$0]  (%p1605_p0), %s628_s20, 128, %s625_s1, %s613_s19  }
 0x3fb PF: > { %s1606_s15 = sld [smem:[#allocation22_spill]]  ;;  %p1609_p11 = scmp.ge.s32.totalorder %s1157_s8, 2 }
 0x3fc   : > { %s1607_s0 = sld [smem:[#allocation28_spill]] }
 0x401   : > { %s639_s10 = sand.u32 1, %s1606_s15  }
 0x402   : > { %p1608_p13 = scmp.ne.s32.totalorder %s1607_s0, 0  ;;  %s640_s6 = scalar_lea.sflag [#allocation10], %s639_s10 }
 0x404   : > { %p838_p6 = pnand %p1609_p11, %p1608_p13 }
 0x406   : > { %p839_p1 = pneg %p838_p6 }
 0x408   : > { %1108 = dma.done.wait (%p839_p1), %s640_s6, 128  }
 0x409   : > { %1110 = vsyncadd (%p839_p1), %s640_s6, 4294967168  ;;  %s30_s8 = sadd.s32 1, %s1157_s8   ;;  %s1610_s25 = sld [smem:[#allocation23_spill]] }
 0x40a   : > { %p27_p3 = scmp.ge.s32.totalorder %s30_s8, 4   ;;  %s1611_s24 = sld [smem:[#allocation26_spill]] }
 0x40b   : > { %s1612_s22 = sld [smem:[#allocation29_spill]]  ;;  %s1614_s0 = smov %s1117_s23 }
 0x40c   : > { %s1613_s9 = sld [smem:[#allocation25_spill]]  ;;  %s1619_s28 = smov %s1141_s29 }
 0x40d   : > { %s1620_s29 = smov %s1145_s30  ;;  %s1622_s6 = smov %s1153_s7 }
 0x40e   :  { %29 = sbr.rel (!%p27_p3) target bundleno = 27 (0x1b), region = 112 }
 0x40f   : > { %s1615_s23 = smov %s1610_s25  ;;  %s1616_s25 = smov %s1129_s26 }
 0x410   : > { %s1617_s26 = smov %s1133_s27  ;;  %s1618_s27 = smov %s1404_s5 }
 0x411   : > { %s1621_s30 = smov %s1612_s22 }
 0x412   : > { %s1623_s7 = smov %s1613_s9 }
 0x413   :  { %645 = vsyncpa [#allocation9], 1 }
 0x414   :  { %647 = vsyncpa [#allocation9 + $0x1], 1 }
 0x415   :  { %648 = vsyncpa [#allocation12], 1 }
 0x416   :  { %650 = vsyncpa [#allocation12 + $0x1], 1 }
 0x417   :  { %651 = vsyncpa [#allocation10], 1 }
 0x418   :  { %653 = vsyncpa [#allocation10 + $0x1], 1 }

</bundles_post_ra>
